<compile_context>
chip_gen: v7x
topology: tpu7x:2x2x1
jax: 0.10.0
libtpu: 0.0.40
codegen_flags: <defaults>
</compile_context>

<pallas_src>
import functools

import jax
import jax.numpy as jnp
from jax import lax
from jax.experimental import pallas as pl
from jax.experimental.pallas import tpu as pltpu

BN_EPS = 1e-5


# ------------------------------- Pallas kernel -------------------------------

def _basic_block_kernel(x_ref, w1_ref, s1_ref, t1_ref, w2_ref, s2_ref, t2_ref,
                        o_ref, *, dilation):
    """Fused BasicBlock for one batch element.

    x_ref : (1, L, C)   input, channels on lanes
    w?_ref: (3*Cin, D)  conv weights, the 3 taps concatenated along K
    s?/t? : (1, D)      folded BatchNorm scale / shift
    o_ref : (1, L, D)
    """
    x = x_ref[0]                                       # (L, C)
    L = x.shape[0]
    d = dilation

    # Tap-validity masks: the rolled copies wrap around, conv padding is zero.
    row = lax.broadcasted_iota(jnp.int32, (L, 1), 0)
    left_ok = (row >= d).astype(x.dtype)               # zero rows where l - d < 0
    right_ok = (row < L - d).astype(x.dtype)           # zero rows where l + d >= L

    def conv3(h, w):
        # h[l-d], h[l], h[l+d] stacked along channels -> ONE MXU matmul.
        h_m = pltpu.roll(h, d, 0) * left_ok            # h[l - d]
        h_p = pltpu.roll(h, L - d, 0) * right_ok       # h[l + d]
        taps = jnp.concatenate([h_m, h, h_p], axis=-1)         # (L, 3*Ch)
        return jnp.dot(taps, w, preferred_element_type=jnp.float32)

    h = conv3(x, w1_ref[...])
    h = jnp.maximum(h * s1_ref[...] + t1_ref[...], 0.0)        # bn1 + relu
    y = conv3(h, w2_ref[...])
    y = y * s2_ref[...] + t2_ref[...]                          # bn2
    o_ref[0] = jnp.maximum(y + x, 0.0)                         # + residual, relu


# ----------------------------- wrapper / params ------------------------------

def _fold_bn(bn):
    scale = bn["gamma"] / jnp.sqrt(bn["var"] + BN_EPS)
    shift = bn["beta"] - bn["mean"] * scale
    return scale.reshape(1, -1), shift.reshape(1, -1)


def prepare_params(p):
    """One-time weight re-layout + BN folding (hoisted out of the jitted fwd)."""
    def cat_taps(w_oik):          # (O, I, 3) -> (3I, O); rows [kI:(k+1)I] = tap k
        return jnp.concatenate([w_oik[:, :, k].T for k in range(3)], axis=0)
    s1, t1 = _fold_bn(p["bn1"])
    s2, t2 = _fold_bn(p["bn2"])
    return dict(w1=cat_taps(p["w1"]), s1=s1, t1=t1,
                w2=cat_taps(p["w2"]), s2=s2, t2=t2)


def basic_block_forward(x_ncl, prep, dilation=1):
    """x_ncl: (N, C, L) PyTorch Conv1d layout. Returns (N, D, L)."""
    x = jnp.transpose(x_ncl, (0, 2, 1)).astype(jnp.float32)    # NCL -> NLC
    N, L, C = x.shape
    D = prep["w1"].shape[1]
    full2 = lambda n: (0, 0)
    out_nlc = pl.pallas_call(
        functools.partial(_basic_block_kernel, dilation=dilation),
        out_shape=jax.ShapeDtypeStruct((N, L, D), jnp.float32),
        grid=(N,),
        in_specs=[
            pl.BlockSpec((1, L, C), lambda n: (n, 0, 0)),      # x
            pl.BlockSpec((3 * C, D), full2),                   # w1 (taps on K)
            pl.BlockSpec((1, D), full2),                       # s1
            pl.BlockSpec((1, D), full2),                       # t1
            pl.BlockSpec((3 * D, D), full2),                   # w2 (taps on K)
            pl.BlockSpec((1, D), full2),                       # s2
            pl.BlockSpec((1, D), full2),                       # t2
        ],
        out_specs=pl.BlockSpec((1, L, D), lambda n: (n, 0, 0)),
        compiler_params=pltpu.CompilerParams(
            dimension_semantics=("parallel",)),
    )(x, prep["w1"], prep["s1"], prep["t1"], prep["w2"], prep["s2"], prep["t2"])
    return jnp.transpose(out_nlc, (0, 2, 1))                   # NLC -> NCL


# -------------------------- deterministic parameters -------------------------

def init_params(key, in_channels, out_channels):
    def conv_w(k, out_c, in_c, ksz):
        bound = 1.0 / (in_c * ksz) ** 0.5
        return jax.random.uniform(k, (out_c, in_c, ksz), jnp.float32, -bound, bound)

    def bn_params(k, c):
        k1, k2, k3, k4 = jax.random.split(k, 4)
        return dict(
            gamma=jax.random.uniform(k1, (c,), jnp.float32, 0.5, 1.5),
            beta=jax.random.uniform(k2, (c,), jnp.float32, -0.1, 0.1),
            mean=jax.random.uniform(k3, (c,), jnp.float32, -0.1, 0.1),
            var=jax.random.uniform(k4, (c,), jnp.float32, 0.5, 1.5),
        )

    k1, k2, k3, k4 = jax.random.split(key, 4)
    return dict(
        w1=conv_w(k1, out_channels, in_channels, 3),
        bn1=bn_params(k2, out_channels),
        w2=conv_w(k3, out_channels, out_channels, 3),
        bn2=bn_params(k4, out_channels),
    )


# ------------------------------ pure-JAX reference ---------------------------

def reference_forward(x_ncl, p, dilation=1):
    def conv(x, w):
        return lax.conv_general_dilated(
            x, w, window_strides=(1,), padding=[(dilation, dilation)],
            rhs_dilation=(dilation,),
            dimension_numbers=("NCH", "OIH", "NCH"),
            precision=lax.Precision.HIGHEST)

    def bn(x, b):
        s = b["gamma"] / jnp.sqrt(b["var"] + BN_EPS)
        t = b["beta"] - b["mean"] * s
        return x * s[None, :, None] + t[None, :, None]

    h = jnp.maximum(bn(conv(x_ncl, p["w1"]), p["bn1"]), 0.0)
    y = bn(conv(h, p["w2"]), p["bn2"])
    return jnp.maximum(y + x_ncl, 0.0)


# ------------------------------------ main ------------------------------------

if __name__ == "__main__":
    key = jax.random.PRNGKey(0)
    fwd = jax.jit(basic_block_forward, static_argnames=("dilation",))

    configs = [
        dict(N=2, C=32, L=128, dilation=1),    # default BasicBlock(32, 32)
        dict(N=2, C=16, L=64, dilation=2),     # dilated variant
    ]
    for i, cfg in enumerate(configs):
        kp, kx, key = jax.random.split(key, 3)
        params = init_params(kp, cfg["C"], cfg["C"])
        prep = prepare_params(params)          # one-time prep, outside jit
        x = jax.random.normal(kx, (cfg["N"], cfg["C"], cfg["L"]), jnp.float32)

        out = jax.block_until_ready(fwd(x, prep, dilation=cfg["dilation"]))
        ref = reference_forward(x, params, dilation=cfg["dilation"])

        assert out.shape == ref.shape, (out.shape, ref.shape)
        assert bool(jnp.all(jnp.isfinite(out)))
        rel_err = jnp.max(jnp.abs(out - ref)) / (jnp.max(jnp.abs(ref)) + 1e-6)
        # Kernel runs the native (default-precision) MXU path with f32
        # accumulation; reference is full-f32 HIGHEST, so allow a small gap.
        assert bool(rel_err < 2e-2), f"config {i}: rel_err={rel_err}"

    print("KERNEL_OK")
</pallas_src>

<mosaic_0001>
module attributes {stable_mosaic.version = 11 : i64} {
  func.func @_basic_block_kernel(%arg0: i32, %arg1: memref<1x128x32xf32, #tpu.memory_space<vmem>>, %arg2: memref<96x32xf32, #tpu.memory_space<vmem>>, %arg3: memref<1x32xf32, #tpu.memory_space<vmem>>, %arg4: memref<1x32xf32, #tpu.memory_space<vmem>>, %arg5: memref<96x32xf32, #tpu.memory_space<vmem>>, %arg6: memref<1x32xf32, #tpu.memory_space<vmem>>, %arg7: memref<1x32xf32, #tpu.memory_space<vmem>>, %arg8: memref<1x128x32xf32, #tpu.memory_space<vmem>>) attributes {dimension_semantics = [#tpu.dimension_semantics<parallel>], iteration_bounds = array<i64: 2>, scalar_prefetch = 0 : i64, scratch_operands = 0 : i64, tpu.core_type = #tpu.core_type<tc>, window_params = [{transform_indices = @transform_0, window_bounds = array<i64: 1, 128, 32>}, {pipeline_mode = #tpu.pipeline_mode<synchronous>, transform_indices = @transform_1, window_bounds = array<i64: 96, 32>}, {pipeline_mode = #tpu.pipeline_mode<synchronous>, transform_indices = @transform_2, window_bounds = array<i64: 1, 32>}, {pipeline_mode = #tpu.pipeline_mode<synchronous>, transform_indices = @transform_3, window_bounds = array<i64: 1, 32>}, {pipeline_mode = #tpu.pipeline_mode<synchronous>, transform_indices = @transform_4, window_bounds = array<i64: 96, 32>}, {pipeline_mode = #tpu.pipeline_mode<synchronous>, transform_indices = @transform_5, window_bounds = array<i64: 1, 32>}, {pipeline_mode = #tpu.pipeline_mode<synchronous>, transform_indices = @transform_6, window_bounds = array<i64: 1, 32>}, {transform_indices = @transform_7, window_bounds = array<i64: 1, 128, 32>}]} {
    %c0 = arith.constant 0 : index
    %c0_0 = arith.constant 0 : index
    %c0_1 = arith.constant 0 : index
    %0 = vector.load %arg1[%c0, %c0_0, %c0_1] : memref<1x128x32xf32, #tpu.memory_space<vmem>>, vector<1x128x32xf32>
    %1 = vector.shape_cast %0 : vector<1x128x32xf32> to vector<128x32xf32>
    %2 = tpu.iota {dimensions = array<i32: 0>} : vector<128x1xi32>
    %c1_i32 = arith.constant 1 : i32
    %3 = vector.broadcast %c1_i32 : i32 to vector<128x1xi32>
    %4 = arith.cmpi sge, %2, %3 : vector<128x1xi32>
    %5 = arith.extui %4 : vector<128x1xi1> to vector<128x1xi32>
    %6 = arith.sitofp %5 : vector<128x1xi32> to vector<128x1xf32>
    %c127_i32 = arith.constant 127 : i32
    %7 = vector.broadcast %c127_i32 : i32 to vector<128x1xi32>
    %8 = arith.cmpi slt, %2, %7 : vector<128x1xi32>
    %9 = arith.extui %8 : vector<128x1xi1> to vector<128x1xi32>
    %10 = arith.sitofp %9 : vector<128x1xi32> to vector<128x1xf32>
    %c0_2 = arith.constant 0 : index
    %c0_3 = arith.constant 0 : index
    %11 = vector.load %arg2[%c0_2, %c0_3] : memref<96x32xf32, #tpu.memory_space<vmem>>, vector<96x32xf32>
    %c1_i32_4 = arith.constant 1 : i32
    %12 = tpu.dynamic_rotate %1 by %c1_i32_4 dim 0 : vector<128x32xf32>, i32 -> vector<128x32xf32>
    %13 = vector.broadcast %6 : vector<128x1xf32> to vector<128x32xf32>
    %14 = arith.mulf %12, %13 : vector<128x32xf32>
    %c127_i32_5 = arith.constant 127 : i32
    %15 = tpu.dynamic_rotate %1 by %c127_i32_5 dim 0 : vector<128x32xf32>, i32 -> vector<128x32xf32>
    %16 = vector.broadcast %10 : vector<128x1xf32> to vector<128x32xf32>
    %17 = arith.mulf %15, %16 : vector<128x32xf32>
    %18 = tpu.concatenate %14, %1, %17 in 1 : vector<128x32xf32>, vector<128x32xf32>, vector<128x32xf32> -> vector<128x96xf32>
    %cst = arith.constant dense<0.000000e+00> : vector<128x32xf32>
    %19 = tpu.matmul %18, %11, %cst {dimension_numbers = #tpu.dot_dimension_numbers<[1], [0], [0], [1], [0, 0, 1, 1], [], []>} : vector<128x96xf32>, vector<96x32xf32>, vector<128x32xf32> -> vector<128x32xf32>
    %c0_6 = arith.constant 0 : index
    %c0_7 = arith.constant 0 : index
    %20 = vector.load %arg3[%c0_6, %c0_7] : memref<1x32xf32, #tpu.memory_space<vmem>>, vector<1x32xf32>
    %21 = vector.broadcast %20 : vector<1x32xf32> to vector<128x32xf32>
    %22 = arith.mulf %19, %21 : vector<128x32xf32>
    %c0_8 = arith.constant 0 : index
    %c0_9 = arith.constant 0 : index
    %23 = vector.load %arg4[%c0_8, %c0_9] : memref<1x32xf32, #tpu.memory_space<vmem>>, vector<1x32xf32>
    %24 = vector.broadcast %23 : vector<1x32xf32> to vector<128x32xf32>
    %25 = arith.addf %22, %24 : vector<128x32xf32>
    %cst_10 = arith.constant 0.000000e+00 : f32
    %26 = vector.broadcast %cst_10 : f32 to vector<128x32xf32>
    %27 = arith.maximumf %25, %26 : vector<128x32xf32>
    %c0_11 = arith.constant 0 : index
    %c0_12 = arith.constant 0 : index
    %28 = vector.load %arg5[%c0_11, %c0_12] : memref<96x32xf32, #tpu.memory_space<vmem>>, vector<96x32xf32>
    %c1_i32_13 = arith.constant 1 : i32
    %29 = tpu.dynamic_rotate %27 by %c1_i32_13 dim 0 : vector<128x32xf32>, i32 -> vector<128x32xf32>
    %30 = vector.broadcast %6 : vector<128x1xf32> to vector<128x32xf32>
    %31 = arith.mulf %29, %30 : vector<128x32xf32>
    %c127_i32_14 = arith.constant 127 : i32
    %32 = tpu.dynamic_rotate %27 by %c127_i32_14 dim 0 : vector<128x32xf32>, i32 -> vector<128x32xf32>
    %33 = vector.broadcast %10 : vector<128x1xf32> to vector<128x32xf32>
    %34 = arith.mulf %32, %33 : vector<128x32xf32>
    %35 = tpu.concatenate %31, %27, %34 in 1 : vector<128x32xf32>, vector<128x32xf32>, vector<128x32xf32> -> vector<128x96xf32>
    %cst_15 = arith.constant dense<0.000000e+00> : vector<128x32xf32>
    %36 = tpu.matmul %35, %28, %cst_15 {dimension_numbers = #tpu.dot_dimension_numbers<[1], [0], [0], [1], [0, 0, 1, 1], [], []>} : vector<128x96xf32>, vector<96x32xf32>, vector<128x32xf32> -> vector<128x32xf32>
    %c0_16 = arith.constant 0 : index
    %c0_17 = arith.constant 0 : index
    %37 = vector.load %arg6[%c0_16, %c0_17] : memref<1x32xf32, #tpu.memory_space<vmem>>, vector<1x32xf32>
    %38 = vector.broadcast %37 : vector<1x32xf32> to vector<128x32xf32>
    %39 = arith.mulf %36, %38 : vector<128x32xf32>
    %c0_18 = arith.constant 0 : index
    %c0_19 = arith.constant 0 : index
    %40 = vector.load %arg7[%c0_18, %c0_19] : memref<1x32xf32, #tpu.memory_space<vmem>>, vector<1x32xf32>
    %41 = vector.broadcast %40 : vector<1x32xf32> to vector<128x32xf32>
    %42 = arith.addf %39, %41 : vector<128x32xf32>
    %43 = arith.addf %42, %1 : vector<128x32xf32>
    %cst_20 = arith.constant 0.000000e+00 : f32
    %44 = vector.broadcast %cst_20 : f32 to vector<128x32xf32>
    %45 = arith.maximumf %43, %44 : vector<128x32xf32>
    %c0_21 = arith.constant 0 : index
    %c0_22 = arith.constant 0 : index
    %c0_23 = arith.constant 0 : index
    %46 = vector.load %arg8[%c0_21, %c0_22, %c0_23] : memref<1x128x32xf32, #tpu.memory_space<vmem>>, vector<1x128x32xf32>
    %47 = vector.shape_cast %46 : vector<1x128x32xf32> to vector<128x32xf32>
    %48 = vector.shape_cast %45 : vector<128x32xf32> to vector<1x128x32xf32>
    tpu.vector_store %arg8[%c0_21, %c0_22, %c0_23], %48 {strides = array<i32>} : memref<1x128x32xf32, #tpu.memory_space<vmem>>, vector<1x128x32xf32>,
    return
  }
  func.func @transform_0(%arg0: i32) -> (i32, i32, i32) {
    %c0_i32 = arith.constant 0 : i32
    %c0_i32_0 = arith.constant 0 : i32
    %c0_i32_1 = arith.constant 0 : i32
    return %arg0, %c0_i32, %c0_i32_0 : i32, i32, i32
  }
  func.func @transform_1(%arg0: i32) -> (i32, i32) {
    %c0_i32 = arith.constant 0 : i32
    %c0_i32_0 = arith.constant 0 : i32
    %c0_i32_1 = arith.constant 0 : i32
    return %c0_i32, %c0_i32_0 : i32, i32
  }
  func.func @transform_2(%arg0: i32) -> (i32, i32) {
    %c0_i32 = arith.constant 0 : i32
    %c0_i32_0 = arith.constant 0 : i32
    %c0_i32_1 = arith.constant 0 : i32
    return %c0_i32, %c0_i32_0 : i32, i32
  }
  func.func @transform_3(%arg0: i32) -> (i32, i32) {
    %c0_i32 = arith.constant 0 : i32
    %c0_i32_0 = arith.constant 0 : i32
    %c0_i32_1 = arith.constant 0 : i32
    return %c0_i32, %c0_i32_0 : i32, i32
  }
  func.func @transform_4(%arg0: i32) -> (i32, i32) {
    %c0_i32 = arith.constant 0 : i32
    %c0_i32_0 = arith.constant 0 : i32
    %c0_i32_1 = arith.constant 0 : i32
    return %c0_i32, %c0_i32_0 : i32, i32
  }
  func.func @transform_5(%arg0: i32) -> (i32, i32) {
    %c0_i32 = arith.constant 0 : i32
    %c0_i32_0 = arith.constant 0 : i32
    %c0_i32_1 = arith.constant 0 : i32
    return %c0_i32, %c0_i32_0 : i32, i32
  }
  func.func @transform_6(%arg0: i32) -> (i32, i32) {
    %c0_i32 = arith.constant 0 : i32
    %c0_i32_0 = arith.constant 0 : i32
    %c0_i32_1 = arith.constant 0 : i32
    return %c0_i32, %c0_i32_0 : i32, i32
  }
  func.func @transform_7(%arg0: i32) -> (i32, i32, i32) {
    %c0_i32 = arith.constant 0 : i32
    %c0_i32_0 = arith.constant 0 : i32
    %c0_i32_1 = arith.constant 0 : i32
    return %arg0, %c0_i32, %c0_i32_0 : i32, i32, i32
  }
}

</mosaic_0001>

<bundles_post_ra>
// kernel: basic_block_forward.1
= control target key start
LH: loop header
LB: loop body
LE: loop exit
PB: predicated region body
PF: predicated region fallthrough
CT: control target
= control target key end

     0   :  { %s1861_s24 = smov 0   ;;  %s2557_s0 = inlined_call_operand.vmem [shape: f32[2,128,32], index: 0, kind: input, shape index: {}]   ;;  %s2558_s1 = inlined_call_operand.vmem [shape: f32[96,32], index: 1, kind: input, shape index: {}]   ;;  %s2559_s2 = inlined_call_operand.vmem [shape: f32[1,32], index: 2, kind: input, shape index: {}]   ;;  %s2560_s3 = inlined_call_operand.vmem [shape: f32[1,32], index: 3, kind: input, shape index: {}]   ;;  %s2561_s4 = inlined_call_operand.vmem [shape: f32[96,32], index: 4, kind: input, shape index: {}]   ;;  %s2562_s5 = inlined_call_operand.vmem [shape: f32[1,32], index: 5, kind: input, shape index: {}]   ;;  %s2563_s6 = inlined_call_operand.vmem [shape: f32[1,32], index: 6, kind: input, shape index: {}]   ;;  %s2564_s7 = inlined_call_operand.vmem [shape: f32[2,128,32], index: 7, kind: output, shape index: {}]  }
   0x1 LB: > { %s1546_s25 = sadd.s32 4294967295, %s1816_s24   ;;  %p1550_p0 = scmp.ge.s32.totalorder %s1816_s24, 1  ;;  %s1816_s24 = sphi %s1861_s24, %s17_s24  }
   0x2   : > { %p237_p1 = scmp.lt.s32.totalorder %s1816_s24, 3 }
   0x4   : > { %p238_p2 = pnand %p1550_p0, %p237_p1 }
   0x5   : > { %p269_p3 = scmp.lt.s32.totalorder (!%p238_p2), %s1546_s25, 1  ;;  %v295_v0 = vlaneseq (!%p238_p2)  ;;  %v408_v1 = vld [vmem:[%s2558_s1] sm:$0xff] (!%p238_p2)  ;;  %v409_v2 = vld [vmem:[%s2558_s1 + $0x8] sm:$0xff] (!%p238_p2)  ;;  %v410_v3 = vld [vmem:[%s2558_s1 + $0x10] sm:$0xff] (!%p238_p2)  ;;  %s1818_s23 = smov (!%p238_p2), 32   ;;  %vm646_vm4 = vcmask (!%p238_p2), 261120  }
   0x6   : > { %241 = sbr.rel (%p238_p2) target bundleno = 759 (0x2f7), region = 48  ;;  %v1749_v4 = vpack.c.bf16 (!%p238_p2), %v409_v2, %v408_v1  ;;  %v411_v5 = vld [vmem:[%s2558_s1 + $0x18] sm:$0xff] (!%p238_p2)  ;;  %v412_v7 = vld [vmem:[%s2558_s1 + $0x20] sm:$0xff] (!%p238_p2)  ;;  %v413_v8 = vld [vmem:[%s2558_s1 + $0x28] sm:$0xff] (!%p238_p2)  ;;  %s1819_s30 = smov (!%p238_p2), 64   ;;  %vm663_vm5 = vcmask (!%p238_p2), 523264  }
   0x7   : > { %v1753_v6 = vpack.c.bf16 (!%p238_p2), %v411_v5, %v410_v3  ;;  %v1889_v9 = vshrl.u32 (!%p238_p2), %v295_v0, 7  ;;  %v1757_v10 = vpack.c.bf16 (!%p238_p2), %v413_v8, %v412_v7  ;;  %v414_v11 = vld [vmem:[%s2558_s1 + $0x30] sm:$0xff] (!%p238_p2)  ;;  %v415_v12 = vld [vmem:[%s2558_s1 + $0x38] sm:$0xff] (!%p238_p2)  ;;  %v416_v23 = vld [vmem:[%s2558_s1 + $0x40] sm:$0xff] (!%p238_p2)  ;;  %v1820_v3 = vmov (!%p238_p2), 0.0  }
   0x8   : > { %1750 = vmatprep.subr.bf16.mxu0 (!%p238_p2), %v1749_v4  ;;  %v1761_v21 = vpack.c.bf16 (!%p238_p2), %v415_v12, %v414_v11  ;;  %v417_v24 = vld [vmem:[%s2558_s1 + $0x48] sm:$0xff] (!%p238_p2)  ;;  %v418_v29 = vld [vmem:[%s2558_s1 + $0x50] sm:$0xff] (!%p238_p2)  ;;  %v419_v30 = vld [vmem:[%s2558_s1 + $0x58] sm:$0xff] (!%p238_p2)  ;;  %vm680_vm6 = vcmask (!%p238_p2), 785408  }
   0x9   : > { %1752 = vmatpush3.bf16.msra.mxu0 (!%p238_p2), %v1749_v4  ;;  %vm485_vm0 = vcmp.lt.s32.totalorder (!%p238_p2), %v1889_v9, 7  ;;  %v1765_v28 = vpack.c.bf16 (!%p238_p2), %v417_v24, %v416_v23  ;;  %v1769_v35 = vpack.c.bf16 (!%p238_p2), %v419_v30, %v418_v29  ;;  %v311_v63 = vadd.s32 (!%p238_p2), 120, %v1889_v9 }
   0xa   : > { %1754 = vmatprep.subr.bf16.mxu0 (!%p238_p2), %v1753_v6  ;;  %vm312_vm2 = vcmp.ge.s32.totalorder (!%p238_p2), %v1889_v9, 1  ;;  %vm436_vm3 = vcmp.lt.s32.totalorder (!%p238_p2), %v1889_v9, 1 }
   0xb   : > { %vm375_vm1 = vcmp.lt.s32.totalorder (!%p238_p2), %v311_v63, 127  ;;  %v2074_v11 = vsel (!%p238_p2), %vm312_vm2, 1.0, %v1820_v3 }
   0xc   : > { %v2055_v4 = vsel (!%p238_p2), %vm375_vm1, 1.0, %v1820_v3 }
   0xd   : > { %s2566_s25 = smov (!%p269_p3, %s1546_s25), 1  ;;  %1756 = vmatpush3.bf16.msra.mxu0 %v1753_v6 }
   0xe   : > { %s1595_s15 = sshll.u32 %s2566_s25, 7  ;;  %1758 = vmatprep.subr.bf16.mxu0 %v1757_v10 }
   0xf   : > { %s1897_s18 = scalar_lea.vmem %s2557_s0, %s1595_s15  ;;  %s2477_s10 = scalar_lea.vmem %s2564_s7, %s1595_s15 }
  0x10   : > { %v1906_v13 = vld [vmem:[%s1897_s18 + $0x18] sm:$0xff]  ;;  %v1909_v14 = vld [vmem:[%s1897_s18] sm:$0xff]  ;;  %v1912_v15 = vld [vmem:[%s1897_s18 + $0x8] sm:$0xff] }
  0x11   : > { %540 = vrot.lane.b32.xlu1 %v1906_v13, %s1818_s23  ;;  %534 = vrot.lane.b32.xlu0 %v1909_v14, %s1818_s23  ;;  %v469_v16 = vrot.slane %v1909_v14, 1  ;;  %v1921_v17 = vld [vmem:[%s1897_s18 + $0x10] sm:$0xff]  ;;  %v470_v18 = vrot.slane %v1912_v15, 1  ;;  %v1926_v20 = vld [vmem:[%s1897_s18 + $0x20] sm:$0xff]  ;;  %v472_v26 = vrot.slane %v1906_v13, 1  ;;  %v420_v8 = vrot.slane %v1909_v14, 7 }
  0x12   : > { %v471_v19 = vrot.slane %v1921_v17, 1  ;;  %v473_v27 = vrot.slane %v1926_v20, 1  ;;  %1760 = vmatpush3.bf16.msra.mxu0 %v1757_v10  ;;  %v1959_v33 = vld [vmem:[%s1897_s18 + $0x28] sm:$0xff]  ;;  %v1962_v34 = vld [vmem:[%s1897_s18 + $0x30] sm:$0xff]  ;;  %v1977_v40 = vld [vmem:[%s1897_s18 + $0x38] sm:$0xff] }
  0x13   : > { %v500_v22 = vsel %vm485_vm0, %v469_v16, %v470_v18  ;;  %1762 = vmatprep.subr.bf16.mxu0 %v1761_v21  ;;  %v474_v36 = vrot.slane %v1959_v33, 1  ;;  %v475_v37 = vrot.slane %v1962_v34, 1  ;;  %v1980_v41 = vld [vmem:[%s1897_s18 + $0x40] sm:$0xff]  ;;  %v476_v42 = vrot.slane %v1977_v40, 1  ;;  %v1995_v46 = vld [vmem:[%s1897_s18 + $0x48] sm:$0xff]  ;;  %v1998_v47 = vld [vmem:[%s1897_s18 + $0x50] sm:$0xff] }
  0x14   : > { %v499_v25 = vsel %vm485_vm0, %v470_v18, %v471_v19  ;;  %v498_v31 = vsel %vm485_vm0, %v471_v19, %v472_v26  ;;  %v497_v32 = vsel %vm485_vm0, %v472_v26, %v473_v27  ;;  %v477_v43 = vrot.slane %v1980_v41, 1  ;;  %v2013_v52 = vld [vmem:[%s1897_s18 + $0x58] sm:$0xff]  ;;  %v2016_v53 = vld [vmem:[%s1897_s18 + $0x60] sm:$0xff]  ;;  %v2031_v58 = vld [vmem:[%s1897_s18 + $0x68] sm:$0xff] }
  0x15   : > { %536 = vrot.lane.b32.xlu0 %v1912_v15, %s1818_s23  ;;  %598 = vrot.lane.b32.xlu1 %v500_v22, %s1819_s30  ;;  %v496_v38 = vsel %vm485_vm0, %v473_v27, %v474_v36  ;;  %v495_v39 = vsel %vm485_vm0, %v474_v36, %v475_v37  ;;  %v494_v44 = vsel %vm485_vm0, %v475_v37, %v476_v42  ;;  %v478_v48 = vrot.slane %v1995_v46, 1  ;;  %v2034_v59 = vld [vmem:[%s1897_s18 + $0x70] sm:$0xff]  ;;  %v2041_v62 = vld [vmem:[%s1897_s18 + $0x78] sm:$0xff] }
  0x16   : > { %1764 = vmatpush3.bf16.msra.mxu0 %v1761_v21  ;;  %v493_v45 = vsel %vm485_vm0, %v476_v42, %v477_v43  ;;  %v479_v49 = vrot.slane %v1998_v47, 1  ;;  %v480_v54 = vrot.slane %v2013_v52, 1  ;;  %v481_v55 = vrot.slane %v2016_v53, 1 }
  0x17   : > { %1766 = vmatprep.subr.bf16.mxu0 %v1765_v28  ;;  %v492_v50 = vsel %vm485_vm0, %v477_v43, %v478_v48  ;;  %v482_v60 = vrot.slane %v2031_v58, 1  ;;  %v483_v61 = vrot.slane %v2034_v59, 1  ;;  %v484_v2 = vrot.slane %v2041_v62, 1 }
  0x18   : > { %v491_v51 = vsel %vm485_vm0, %v478_v48, %v479_v49  ;;  %v490_v56 = vsel %vm485_vm0, %v479_v49, %v480_v54  ;;  %v489_v57 = vsel %vm485_vm0, %v480_v54, %v481_v55  ;;  %v435_v10 = vrot.slane %v2041_v62, 7 }
  0x19   : > { %538 = vrot.lane.b32.xlu0 %v1921_v17, %s1818_s23  ;;  %600 = vrot.lane.b32.xlu1 %v499_v25, %s1819_s30  ;;  %v488_v0 = vsel %vm485_vm0, %v481_v55, %v482_v60  ;;  %v487_v1 = vsel %vm485_vm0, %v482_v60, %v483_v61  ;;  %v501_v5 = vsel %vm485_vm0, %v484_v2, %v469_v16  ;;  %v421_v21 = vrot.slane %v1912_v15, 7 }
  0x1a   : > { %1768 = vmatpush3.bf16.msra.mxu0 %v1765_v28  ;;  %v517_v6 = vmul.f32 %v2055_v4, %v501_v5  ;;  %v486_v7 = vsel %vm485_vm0, %v483_v61, %v484_v2  ;;  %v452_v12 = vsel %vm436_vm3, %v435_v10, %v420_v8  ;;  %v423_v25 = vrot.slane %v1906_v13, 7 }
  0x1b   : > { %1770 = vmatprep.subr.bf16.mxu0 %v1769_v35  ;;  %v453_v19 = vmul.f32 %v2074_v11, %v452_v12  ;;  %v422_v26 = vrot.slane %v1921_v17, 7  ;;  %v451_v27 = vsel %vm436_vm3, %v420_v8, %v421_v21  ;;  %v425_v36 = vrot.slane %v1959_v33, 7 }
  0x1c   : > { %v424_v37 = vrot.slane %v1926_v20, 7  ;;  %v427_v54 = vrot.slane %v1977_v40, 7  ;;  %v426_v55 = vrot.slane %v1962_v34, 7 }
  0x1d   : > { %602 = vrot.lane.b32.xlu0 %v498_v31, %s1819_s30  ;;  %604 = vrot.lane.b32.xlu1 %v497_v32, %s1819_s30  ;;  %v449_v32 = vsel %vm436_vm3, %v422_v26, %v423_v25 }
  0x1e   : > { %1772 = vmatpush3.bf16.msra.mxu0 %v1769_v35  ;;  %v450_v35 = vsel %vm436_vm3, %v421_v21, %v422_v26  ;;  %v447_v48 = vsel %vm436_vm3, %v424_v37, %v425_v36  ;;  %v446_v3 = vsel %vm436_vm3, %v425_v36, %v426_v55  ;;  %v431_v26 = vrot.slane %v2013_v52, 7 }
  0x21   : > { %542 = vrot.lane.b32.xlu0 %v1926_v20, %s1818_s23  ;;  %544 = vrot.lane.b32.xlu1 %v1959_v33, %s1818_s23  ;;  %v448_v20 = vsel %vm436_vm3, %v423_v25, %v424_v37 }
  0x25   : > { %606 = vrot.lane.b32.xlu0 %v496_v38, %s1819_s30  ;;  %608 = vrot.lane.b32.xlu1 %v495_v39, %s1819_s30 }
  0x29   : > { %546 = vrot.lane.b32.xlu0 %v1962_v34, %s1818_s23  ;;  %548 = vrot.lane.b32.xlu1 %v1977_v40, %s1818_s23 }
  0x2d   : > { %610 = vrot.lane.b32.xlu0 %v494_v44, %s1819_s30  ;;  %612 = vrot.lane.b32.xlu1 %v493_v45, %s1819_s30 }
  0x31   : > { %550 = vrot.lane.b32.xlu0 %v1980_v41, %s1818_s23  ;;  %552 = vrot.lane.b32.xlu1 %v1995_v46, %s1818_s23 }
  0x35   : > { %614 = vrot.lane.b32.xlu0 %v492_v50, %s1819_s30  ;;  %616 = vrot.lane.b32.xlu1 %v491_v51, %s1819_s30 }
  0x39   : > { %554 = vrot.lane.b32.xlu0 %v1998_v47, %s1818_s23  ;;  %556 = vrot.lane.b32.xlu1 %v2013_v52, %s1818_s23 }
  0x3d   : > { %618 = vrot.lane.b32.xlu0 %v490_v56, %s1819_s30  ;;  %620 = vrot.lane.b32.xlu1 %v489_v57, %s1819_s30 }
  0x41   : > { %558 = vrot.lane.b32.xlu0 %v2016_v53, %s1818_s23  ;;  %560 = vrot.lane.b32.xlu1 %v2031_v58, %s1818_s23 }
  0x45   : > { %622 = vrot.lane.b32.xlu0 %v488_v0, %s1819_s30  ;;  %624 = vrot.lane.b32.xlu1 %v487_v1, %s1819_s30  ;;  %v445_v0 = vsel %vm436_vm3, %v426_v55, %v427_v54 }
  0x49   : > { %562 = vrot.lane.b32.xlu0 %v2034_v59, %s1818_s23  ;;  %564 = vrot.lane.b32.xlu1 %v2041_v62, %s1818_s23 }
  0x4d   : > { %626 = vrot.lane.b32.xlu0 %v486_v7, %s1819_s30  ;;  %628 = vrot.lane.b32.xlu1 %v517_v6, %s1819_s30  ;;  %v429_v6 = vrot.slane %v1995_v46, 7  ;;  %v428_v7 = vrot.slane %v1980_v41, 7 }
  0x4f   : > { %v443_v21 = vsel %vm436_vm3, %v428_v7, %v429_v6 }
  0x83   : > { %v541_v16 = vpop.permute.xlu1 %540  ;;  %v535_v18 = vpop.permute.xlu0 %534 }
  0x84   : > { %v647_v22 = vsel %vm646_vm4, %v453_v19, %v535_v18  ;;  %v650_v38 = vsel %vm646_vm4, %v449_v32, %v541_v16 }
  0x87   : > { %v537_v23 = vpop.permute.xlu0 %536  ;;  %v599_v24 = vpop.permute.xlu1 %598 }
  0x88   : > { %v664_v28 = vsel %vm663_vm5, %v647_v22, %v599_v24  ;;  %v648_v29 = vsel %vm646_vm4, %v451_v27, %v537_v23  ;;  %v444_v24 = vsel %vm436_vm3, %v427_v54, %v428_v7  ;;  %v430_v27 = vrot.slane %v1998_v47, 7 }
  0x89   : > { %1677 = vmatprep.mubr.msk.f32.mxu0 %vm680_vm6, %v664_v28 }
  0x8a   : > { %v442_v37 = vsel %vm436_vm3, %v429_v6, %v430_v27 }
  0x8b   : > { %v539_v30 = vpop.permute.xlu0 %538  ;;  %v601_v31 = vpop.permute.xlu1 %600 }
  0x8c   : > { %v665_v13 = vsel %vm663_vm5, %v648_v29, %v601_v31  ;;  %v649_v39 = vsel %vm646_vm4, %v450_v35, %v539_v30  ;;  %v441_v35 = vsel %vm436_vm3, %v430_v27, %v431_v26 }
  0x8d   : > { %1678 = vmatmul.mubr.msk.f32.vlgmr.msra.gmra.mrb[0].mxu0 %vm680_vm6, %v665_v13 }
  0x8f   : > { %v603_v42 = vpop.permute.xlu0 %602  ;;  %v605_v43 = vpop.permute.xlu1 %604 }
  0x90   : > { %v666_v44 = vsel %vm663_vm5, %v649_v39, %v603_v42  ;;  %v667_v45 = vsel %vm663_vm5, %v650_v38, %v605_v43  ;;  %v433_v39 = vrot.slane %v2031_v58, 7  ;;  %v432_v42 = vrot.slane %v2016_v53, 7 }
  0x91   : > { %1680 = vmatprep.mubr.msk.f32.mxu0 %vm680_vm6, %v666_v44 }
  0x92   : > { %1681 = vmatmul.mubr.msk.f32.gmra.mrb[2].mxu0 %vm680_vm6, %v667_v45  ;;  %v440_v54 = vsel %vm436_vm3, %v431_v26, %v432_v42  ;;  %v941_v26 = vld [vmem:[%s2561_s4 + $0x28] sm:$0xff] }
  0x93   : > { %v543_v49 = vpop.permute.xlu0 %542  ;;  %v545_v50 = vpop.permute.xlu1 %544 }
  0x94   : > { %v652_v51 = vsel %vm646_vm4, %v447_v48, %v545_v50  ;;  %v651_v56 = vsel %vm646_vm4, %v448_v20, %v543_v49  ;;  %v439_v50 = vsel %vm436_vm3, %v432_v42, %v433_v39  ;;  %v2219_v42 = vld [vmem:[%s2560_s3] ss:$0 sm:$0xff] }
  0x97   : > { %v607_v57 = vpop.permute.xlu0 %606  ;;  %v609_v60 = vpop.permute.xlu1 %608 }
  0x98   : > { %v668_v61 = vsel %vm663_vm5, %v651_v56, %v607_v57  ;;  %v669_v63 = vsel %vm663_vm5, %v652_v51, %v609_v60  ;;  %v434_v56 = vrot.slane %v2034_v59, 7 }
  0x99   : > { %1683 = vmatprep.mubr.msk.f32.mxu0 %vm680_vm6, %v668_v61 }
  0x9a   : > { %1684 = vmatmul.mubr.msk.f32.gmra.mrb[4].mxu0 %vm680_vm6, %v669_v63 }
  0x9b   : > { %v547_v1 = vpop.permute.xlu0 %546  ;;  %v549_v2 = vpop.permute.xlu1 %548 }
  0x9c   : > { %v654_v5 = vsel %vm646_vm4, %v445_v0, %v549_v2  ;;  %v653_v8 = vsel %vm646_vm4, %v446_v3, %v547_v1  ;;  %v437_v1 = vsel %vm436_vm3, %v434_v56, %v435_v10  ;;  %v936_v10 = vld [vmem:[%s2561_s4] sm:$0xff] }
  0x9f   : > { %v611_v12 = vpop.permute.xlu0 %610  ;;  %v613_v16 = vpop.permute.xlu1 %612 }
  0xa0   : > { %v670_v18 = vsel %vm663_vm5, %v653_v8, %v611_v12  ;;  %v671_v19 = vsel %vm663_vm5, %v654_v5, %v613_v16  ;;  %v438_v5 = vsel %vm436_vm3, %v433_v39, %v434_v56 }
  0xa1   : > { %1686 = vmatprep.mubr.msk.f32.mxu0 %vm680_vm6, %v670_v18 }
  0xa2   : > { %1687 = vmatmul.mubr.msk.f32.gmra.mrb[6].mxu0 %vm680_vm6, %v671_v19  ;;  %v937_v19 = vld [vmem:[%s2561_s4 + $0x8] sm:$0xff] }
  0xa3   : > { %v551_v22 = vpop.permute.xlu0 %550  ;;  %v553_v23 = vpop.permute.xlu1 %552 }
  0xa4   : > { %v656_v25 = vsel %vm646_vm4, %v443_v21, %v553_v23  ;;  %v655_v28 = vsel %vm646_vm4, %v444_v24, %v551_v22  ;;  %v938_v21 = vld [vmem:[%s2561_s4 + $0x10] sm:$0xff]  ;;  %v1773_v22 = vpack.c.bf16 %v937_v19, %v936_v10  ;;  %v939_v23 = vld [vmem:[%s2561_s4 + $0x18] sm:$0xff] }
  0xa5   : > { %v1777_v24 = vpack.c.bf16 %v939_v23, %v938_v21 }
  0xa6   : > { %1774 = vmatprep.subr.bf16.mxu1 %v1773_v22 }
  0xa7   : > { %v615_v29 = vpop.permute.xlu0 %614  ;;  %v617_v30 = vpop.permute.xlu1 %616  ;;  %1776 = vmatpush3.bf16.msra.mxu1 %v1773_v22 }
  0xa8   : > { %v672_v31 = vsel %vm663_vm5, %v655_v28, %v615_v29  ;;  %v673_v32 = vsel %vm663_vm5, %v656_v25, %v617_v30  ;;  %v940_v25 = vld [vmem:[%s2561_s4 + $0x20] sm:$0xff]  ;;  %1778 = vmatprep.subr.bf16.mxu1 %v1777_v24  ;;  %v942_v28 = vld [vmem:[%s2561_s4 + $0x30] sm:$0xff]  ;;  %v943_v29 = vld [vmem:[%s2561_s4 + $0x38] sm:$0xff] }
  0xa9   : > { %1689 = vmatprep.mubr.msk.f32.mxu0 %vm680_vm6, %v672_v31  ;;  %v1781_v27 = vpack.c.bf16 %v941_v26, %v940_v25  ;;  %v1785_v30 = vpack.c.bf16 %v943_v29, %v942_v28  ;;  %v944_v31 = vld [vmem:[%s2561_s4 + $0x40] sm:$0xff] }
  0xaa   : > { %1690 = vmatmul.mubr.msk.f32.gmra.mrb[8].mxu0 %vm680_vm6, %v673_v32  ;;  %v945_v32 = vld [vmem:[%s2561_s4 + $0x48] sm:$0xff] }
  0xab   : > { %v555_v13 = vpop.permute.xlu0 %554  ;;  %v557_v36 = vpop.permute.xlu1 %556  ;;  %1780 = vmatpush3.bf16.msra.mxu1 %v1777_v24 }
  0xac   : > { %v658_v38 = vsel %vm646_vm4, %v441_v35, %v557_v36  ;;  %v657_v43 = vsel %vm646_vm4, %v442_v37, %v555_v13  ;;  %1782 = vmatprep.subr.bf16.mxu1 %v1781_v27  ;;  %v1789_v35 = vpack.c.bf16 %v945_v32, %v944_v31  ;;  %v946_v13 = vld [vmem:[%s2561_s4 + $0x50] sm:$0xff]  ;;  %v947_v36 = vld [vmem:[%s2561_s4 + $0x58] sm:$0xff]  ;;  %v2214_v37 = vld [vmem:[%s2559_s2] ss:$0 sm:$0xff] }
  0xaf   : > { %v619_v44 = vpop.permute.xlu0 %618  ;;  %v621_v45 = vpop.permute.xlu1 %620  ;;  %1784 = vmatpush3.bf16.msra.mxu1 %v1781_v27 }
  0xb0   : > { %v674_v48 = vsel %vm663_vm5, %v657_v43, %v619_v44  ;;  %v675_v49 = vsel %vm663_vm5, %v658_v38, %v621_v45  ;;  %1786 = vmatprep.subr.bf16.mxu1 %v1785_v30  ;;  %v1793_v38 = vpack.c.bf16 %v947_v36, %v946_v13 }
  0xb1   : > { %1692 = vmatprep.mubr.msk.f32.mxu0 %vm680_vm6, %v674_v48 }
  0xb2   : > { %1693 = vmatmul.mubr.msk.f32.gmra.mrb[10].mxu0 %vm680_vm6, %v675_v49 }
  0xb3   : > { %v559_v20 = vpop.permute.xlu0 %558  ;;  %v561_v51 = vpop.permute.xlu1 %560  ;;  %1788 = vmatpush3.bf16.msra.mxu1 %v1785_v30 }
  0xb4   : > { %v660_v55 = vsel %vm646_vm4, %v439_v50, %v561_v51  ;;  %v659_v57 = vsel %vm646_vm4, %v440_v54, %v559_v20  ;;  %1790 = vmatprep.subr.bf16.mxu1 %v1789_v35 }
  0xb7   : > { %v623_v60 = vpop.permute.xlu0 %622  ;;  %v625_v61 = vpop.permute.xlu1 %624  ;;  %1792 = vmatpush3.bf16.msra.mxu1 %v1789_v35 }
  0xb8   : > { %v676_v63 = vsel %vm663_vm5, %v659_v57, %v623_v60  ;;  %v677_v0 = vsel %vm663_vm5, %v660_v55, %v625_v61  ;;  %1794 = vmatprep.subr.bf16.mxu1 %v1793_v38 }
  0xb9   : > { %1695 = vmatprep.mubr.msk.f32.mxu0 %vm680_vm6, %v676_v63 }
  0xba   : > { %1696 = vmatmul.mubr.msk.f32.gmra.mrb[12].mxu0 %vm680_vm6, %v677_v0 }
  0xbb   : > { %v563_v2 = vpop.permute.xlu0 %562  ;;  %v565_v3 = vpop.permute.xlu1 %564  ;;  %1796 = vmatpush3.bf16.msra.mxu1 %v1793_v38 }
  0xbc   : > { %v662_v6 = vsel %vm646_vm4, %v437_v1, %v565_v3  ;;  %v661_v7 = vsel %vm646_vm4, %v438_v5, %v563_v2 }
  0xbf   : > { %v627_v8 = vpop.permute.xlu0 %626  ;;  %v629_v12 = vpop.permute.xlu1 %628 }
  0xc0   : > { %v678_v16 = vsel %vm663_vm5, %v661_v7, %v627_v8  ;;  %v679_v18 = vsel %vm663_vm5, %v662_v6, %v629_v12 }
  0xc1   : > { %1698 = vmatprep.mubr.msk.f32.mxu0 %vm680_vm6, %v678_v16 }
  0xc2   : > { %1699 = vmatmul.mubr.msk.f32.gmra.mrb[14].mxu0 %vm680_vm6, %v679_v18 }
 0x160   : > { %v1679_v39 = vpop.f32.mrb[0].mxu0 }
 0x161   : > { %v882_v43 = vmul.f32 %v1679_v39, %v2214_v37  ;;  %v795_v44 = vpop.f32.mrb[1].mxu0 }
 0x162   : > { %v881_v45 = vmul.f32 %v2214_v37, %v795_v44 }
 0x163   : > { %v905_v48 = vadd.f32 %v2219_v42, %v882_v43 }
 0x164   : > { %v904_v49 = vadd.f32 %v2219_v42, %v881_v45 }
 0x165   : > { %v921_v50 = vmax.f32 %v905_v48, 0.0  ;;  %v1682_v20 = vpop.f32.mrb[2].mxu0 }
 0x166   : > { %v2225_v51 = vmax.f32 %v904_v49, 0.0  ;;  %v884_v54 = vmul.f32 %v1682_v20, %v2214_v37  ;;  %v805_v55 = vpop.f32.mrb[3].mxu0 }
 0x167   : > { %v949_v56 = vrot.slane %v921_v50, 7  ;;  %v883_v57 = vmul.f32 %v2214_v37, %v805_v55  ;;  %1062 = vrot.lane.b32.xlu1 %v921_v50, %s1818_s23  ;;  %v997_v60 = vrot.slane %v921_v50, 1 }
 0x168   : > { %v948_v61 = vrot.slane %v2225_v51, 7  ;;  %v907_v63 = vadd.f32 %v2219_v42, %v884_v54  ;;  %1060 = vrot.lane.b32.xlu0 %v2225_v51, %s1818_s23  ;;  %v996_v0 = vrot.slane %v2225_v51, 1 }
 0x169   : > { %v906_v1 = vadd.f32 %v2219_v42, %v883_v57 }
 0x16a   : > { %v923_v2 = vmax.f32 %v907_v63, 0.0  ;;  %v1026_v3 = vsel %vm485_vm0, %v996_v0, %v997_v60  ;;  %v2244_v5 = vsel %vm436_vm3, %v948_v61, %v949_v56 }
 0x16b   : > { %v922_v6 = vmax.f32 %v906_v1, 0.0 }
 0x16c   : > { %v951_v7 = vrot.slane %v923_v2, 7  ;;  %1124 = vrot.lane.b32.xlu0 %v1026_v3, %s1819_s30  ;;  %1066 = vrot.lane.b32.xlu1 %v923_v2, %s1818_s23  ;;  %v999_v8 = vrot.slane %v923_v2, 1 }
 0x16d   : > { %v950_v12 = vrot.slane %v922_v6, 7  ;;  %v1685_v16 = vpop.f32.mrb[4].mxu0  ;;  %v998_v18 = vrot.slane %v922_v6, 1 }
 0x16e   : > { %v886_v10 = vmul.f32 %v1685_v16, %v2214_v37  ;;  %v815_v19 = vpop.f32.mrb[5].mxu0 }
 0x16f   : > { %v885_v21 = vmul.f32 %v2214_v37, %v815_v19  ;;  %v1025_v22 = vsel %vm485_vm0, %v997_v60, %v998_v18  ;;  %v1024_v23 = vsel %vm485_vm0, %v998_v18, %v999_v8  ;;  %v2256_v24 = vsel %vm436_vm3, %v950_v12, %v951_v7 }
 0x170   : > { %v909_v25 = vadd.f32 %v2219_v42, %v886_v10  ;;  %1064 = vrot.lane.b32.xlu0 %v922_v6, %s1818_s23  ;;  %1126 = vrot.lane.b32.xlu1 %v1025_v22, %s1819_s30  ;;  %v2263_v26 = vsel %vm436_vm3, %v949_v56, %v950_v12 }
 0x171   : > { %v908_v27 = vadd.f32 %v2219_v42, %v885_v21 }
 0x172   : > { %v925_v28 = vmax.f32 %v909_v25, 0.0 }
 0x173   : > { %v924_v29 = vmax.f32 %v908_v27, 0.0 }
 0x174   : > { %v953_v30 = vrot.slane %v925_v28, 7  ;;  %1128 = vrot.lane.b32.xlu0 %v1024_v23, %s1819_s30  ;;  %1070 = vrot.lane.b32.xlu1 %v925_v28, %s1818_s23  ;;  %v1001_v31 = vrot.slane %v925_v28, 1 }
 0x175   : > { %v952_v32 = vrot.slane %v924_v29, 7  ;;  %v1688_v35 = vpop.f32.mrb[6].mxu0  ;;  %v1000_v13 = vrot.slane %v924_v29, 1 }
 0x176   : > { %v888_v36 = vmul.f32 %v1688_v35, %v2214_v37  ;;  %v825_v38 = vpop.f32.mrb[7].mxu0 }
 0x177   : > { %v887_v39 = vmul.f32 %v2214_v37, %v825_v38  ;;  %v1023_v43 = vsel %vm485_vm0, %v999_v8, %v1000_v13  ;;  %v1022_v44 = vsel %vm485_vm0, %v1000_v13, %v1001_v31  ;;  %v2276_v45 = vsel %vm436_vm3, %v952_v32, %v953_v30 }
 0x178   : > { %v911_v48 = vadd.f32 %v2219_v42, %v888_v36  ;;  %1068 = vrot.lane.b32.xlu0 %v924_v29, %s1818_s23  ;;  %1130 = vrot.lane.b32.xlu1 %v1023_v43, %s1819_s30  ;;  %v2283_v49 = vsel %vm436_vm3, %v951_v7, %v952_v32 }
 0x179   : > { %v910_v50 = vadd.f32 %v2219_v42, %v887_v39 }
 0x17a   : > { %v927_v20 = vmax.f32 %v911_v48, 0.0 }
 0x17b   : > { %v926_v54 = vmax.f32 %v910_v50, 0.0 }
 0x17c   : > { %v955_v55 = vrot.slane %v927_v20, 7  ;;  %1132 = vrot.lane.b32.xlu0 %v1022_v44, %s1819_s30  ;;  %1074 = vrot.lane.b32.xlu1 %v927_v20, %s1818_s23  ;;  %v1003_v56 = vrot.slane %v927_v20, 1 }
 0x17d   : > { %v954_v57 = vrot.slane %v926_v54, 7  ;;  %v1691_v60 = vpop.f32.mrb[8].mxu0  ;;  %v1002_v63 = vrot.slane %v926_v54, 1 }
 0x17e   : > { %v890_v1 = vmul.f32 %v1691_v60, %v2214_v37  ;;  %v835_v2 = vpop.f32.mrb[9].mxu0 }
 0x17f   : > { %v889_v3 = vmul.f32 %v2214_v37, %v835_v2  ;;  %v1021_v6 = vsel %vm485_vm0, %v1001_v31, %v1002_v63  ;;  %v1020_v7 = vsel %vm485_vm0, %v1002_v63, %v1003_v56  ;;  %v2296_v8 = vsel %vm436_vm3, %v954_v57, %v955_v55 }
 0x180   : > { %v913_v12 = vadd.f32 %v2219_v42, %v890_v1  ;;  %1072 = vrot.lane.b32.xlu0 %v926_v54, %s1818_s23  ;;  %1134 = vrot.lane.b32.xlu1 %v1021_v6, %s1819_s30  ;;  %v2303_v16 = vsel %vm436_vm3, %v953_v30, %v954_v57 }
 0x181   : > { %v912_v18 = vadd.f32 %v2219_v42, %v889_v3 }
 0x182   : > { %v929_v10 = vmax.f32 %v913_v12, 0.0 }
 0x183   : > { %v928_v19 = vmax.f32 %v912_v18, 0.0 }
 0x184   : > { %v957_v21 = vrot.slane %v929_v10, 7  ;;  %1136 = vrot.lane.b32.xlu0 %v1020_v7, %s1819_s30  ;;  %1078 = vrot.lane.b32.xlu1 %v929_v10, %s1818_s23  ;;  %v1005_v22 = vrot.slane %v929_v10, 1 }
 0x185   : > { %v956_v23 = vrot.slane %v928_v19, 7  ;;  %v1694_v25 = vpop.f32.mrb[10].mxu0  ;;  %v1004_v27 = vrot.slane %v928_v19, 1 }
 0x186   : > { %v892_v28 = vmul.f32 %v1694_v25, %v2214_v37  ;;  %v845_v29 = vpop.f32.mrb[11].mxu0 }
 0x187   : > { %v891_v31 = vmul.f32 %v2214_v37, %v845_v29  ;;  %v1019_v30 = vsel %vm485_vm0, %v1003_v56, %v1004_v27  ;;  %v1018_v32 = vsel %vm485_vm0, %v1004_v27, %v1005_v22  ;;  %v2316_v35 = vsel %vm436_vm3, %v956_v23, %v957_v21 }
 0x188   : > { %v915_v13 = vadd.f32 %v2219_v42, %v892_v28  ;;  %1076 = vrot.lane.b32.xlu0 %v928_v19, %s1818_s23  ;;  %1138 = vrot.lane.b32.xlu1 %v1019_v30, %s1819_s30  ;;  %v2323_v36 = vsel %vm436_vm3, %v955_v55, %v956_v23 }
 0x189   : > { %v914_v38 = vadd.f32 %v2219_v42, %v891_v31 }
 0x18a   : > { %v931_v39 = vmax.f32 %v915_v13, 0.0 }
 0x18b   : > { %v930_v43 = vmax.f32 %v914_v38, 0.0 }
 0x18c   : > { %v959_v44 = vrot.slane %v931_v39, 7  ;;  %1140 = vrot.lane.b32.xlu0 %v1018_v32, %s1819_s30  ;;  %1082 = vrot.lane.b32.xlu1 %v931_v39, %s1818_s23  ;;  %v1007_v48 = vrot.slane %v931_v39, 1 }
 0x18d   : > { %v958_v50 = vrot.slane %v930_v43, 7  ;;  %v1697_v20 = vpop.f32.mrb[12].mxu0  ;;  %v1006_v54 = vrot.slane %v930_v43, 1 }
 0x18e   : > { %v894_v56 = vmul.f32 %v1697_v20, %v2214_v37  ;;  %v855_v57 = vpop.f32.mrb[13].mxu0 }
 0x18f   : > { %v893_v60 = vmul.f32 %v2214_v37, %v855_v57  ;;  %v1017_v55 = vsel %vm485_vm0, %v1005_v22, %v1006_v54  ;;  %v1016_v63 = vsel %vm485_vm0, %v1006_v54, %v1007_v48  ;;  %v2336_v1 = vsel %vm436_vm3, %v958_v50, %v959_v44 }
 0x190   : > { %v917_v2 = vadd.f32 %v2219_v42, %v894_v56  ;;  %1080 = vrot.lane.b32.xlu0 %v930_v43, %s1818_s23  ;;  %1142 = vrot.lane.b32.xlu1 %v1017_v55, %s1819_s30  ;;  %v2343_v3 = vsel %vm436_vm3, %v957_v21, %v958_v50 }
 0x191   : > { %v916_v6 = vadd.f32 %v2219_v42, %v893_v60 }
 0x192   : > { %v933_v7 = vmax.f32 %v917_v2, 0.0 }
 0x193   : > { %v932_v12 = vmax.f32 %v916_v6, 0.0 }
 0x194   : > { %v961_v18 = vrot.slane %v933_v7, 7  ;;  %1144 = vrot.lane.b32.xlu0 %v1016_v63, %s1819_s30  ;;  %1086 = vrot.lane.b32.xlu1 %v933_v7, %s1818_s23  ;;  %v1009_v10 = vrot.slane %v933_v7, 1 }
 0x195   : > { %v960_v19 = vrot.slane %v932_v12, 7  ;;  %v1700_v22 = vpop.f32.mrb[14].mxu0  ;;  %v1008_v23 = vrot.slane %v932_v12, 1 }
 0x196   : > { %v896_v25 = vmul.f32 %v1700_v22, %v2214_v37  ;;  %v865_v27 = vpop.f32.mrb[15].mxu0 }
 0x197   : > { %v895_v28 = vmul.f32 %v2214_v37, %v865_v27  ;;  %v1015_v21 = vsel %vm485_vm0, %v1007_v48, %v1008_v23  ;;  %v1014_v29 = vsel %vm485_vm0, %v1008_v23, %v1009_v10  ;;  %v2356_v31 = vsel %vm436_vm3, %v960_v19, %v961_v18 }
 0x198   : > { %v919_v30 = vadd.f32 %v2219_v42, %v896_v25  ;;  %1084 = vrot.lane.b32.xlu0 %v932_v12, %s1818_s23  ;;  %1146 = vrot.lane.b32.xlu1 %v1015_v21, %s1819_s30  ;;  %v2363_v32 = vsel %vm436_vm3, %v959_v44, %v960_v19 }
 0x199   : > { %v918_v37 = vadd.f32 %v2219_v42, %v895_v28 }
 0x19a   : > { %v935_v13 = vmax.f32 %v919_v30, 0.0 }
 0x19b   : > { %v934_v38 = vmax.f32 %v918_v37, 0.0 }
 0x19c   : > { %v963_v39 = vrot.slane %v935_v13, 7  ;;  %v1011_v43 = vrot.slane %v935_v13, 1  ;;  %1148 = vrot.lane.b32.xlu0 %v1014_v29, %s1819_s30  ;;  %1090 = vrot.lane.b32.xlu1 %v935_v13, %s1818_s23 }
 0x19d   : > { %v962_v48 = vrot.slane %v934_v38, 7  ;;  %v1010_v50 = vrot.slane %v934_v38, 1 }
 0x19e   : > { %v1027_v20 = vsel %vm485_vm0, %v1011_v43, %v996_v0  ;;  %v979_v42 = vsel %vm436_vm3, %v963_v39, %v948_v61 }
 0x19f   : > { %v1013_v44 = vsel %vm485_vm0, %v1009_v10, %v1010_v50  ;;  %v1012_v54 = vsel %vm485_vm0, %v1010_v50, %v1011_v43  ;;  %v2384_v56 = vsel %vm436_vm3, %v962_v48, %v963_v39  ;;  %v2388_v51 = vsel %vm436_vm3, %v961_v18, %v962_v48 }
 0x1a0   : > { %1088 = vrot.lane.b32.xlu0 %v934_v38, %s1818_s23  ;;  %1150 = vrot.lane.b32.xlu1 %v1013_v44, %s1819_s30  ;;  %v1043_v61 = vmul.f32 %v2055_v4, %v1027_v20  ;;  %v980_v60 = vmul.f32 %v2074_v11, %v979_v42 }
 0x1a4   : > { %1154 = vrot.lane.b32.xlu1 %v1043_v61, %s1819_s30  ;;  %1152 = vrot.lane.b32.xlu0 %v1012_v54, %s1819_s30 }
 0x1d9   : > { %v1063_v0 = vpop.permute.xlu1 %1062 }
 0x1da   : > { %v1061_v57 = vpop.permute.xlu0 %1060  ;;  %v1173_v9 = vsel %vm646_vm4, %v2244_v5, %v1063_v0 }
 0x1db   : > { %v1172_v55 = vsel %vm646_vm4, %v980_v60, %v1061_v57 }
 0x1de   : > { %v1125_v63 = vpop.permute.xlu0 %1124  ;;  %v1067_v2 = vpop.permute.xlu1 %1066 }
 0x1df   : > { %v1188_v6 = vsel %vm663_vm5, %v1172_v55, %v1125_v63  ;;  %v1175_v22 = vsel %vm646_vm4, %v2256_v24, %v1067_v2 }
 0x1e0   : > { %1725 = vmatprep.mubr.msk.f32.mxu1 %vm680_vm6, %v1188_v6 }
 0x1e2   : > { %v1065_v4 = vpop.permute.xlu0 %1064  ;;  %v1127_v7 = vpop.permute.xlu1 %1126 }
 0x1e3   : > { %v1189_v12 = vsel %vm663_vm5, %v1173_v9, %v1127_v7  ;;  %v1174_v11 = vsel %vm646_vm4, %v2263_v26, %v1065_v4 }
 0x1e4   : > { %1726 = vmatmul.mubr.msk.f32.vlgmr.msra.gmra.mrb[0].mxu1 %vm680_vm6, %v1189_v12 }
 0x1e6   : > { %v1129_v18 = vpop.permute.xlu0 %1128  ;;  %v1071_v10 = vpop.permute.xlu1 %1070 }
 0x1e7   : > { %v1190_v19 = vsel %vm663_vm5, %v1174_v11, %v1129_v18  ;;  %v1177_v29 = vsel %vm646_vm4, %v2276_v45, %v1071_v10 }
 0x1e8   : > { %1728 = vmatprep.mubr.msk.f32.mxu1 %vm680_vm6, %v1190_v19 }
 0x1ea   : > { %v1069_v23 = vpop.permute.xlu0 %1068  ;;  %v1131_v5 = vpop.permute.xlu1 %1130 }
 0x1eb   : > { %v1191_v25 = vsel %vm663_vm5, %v1175_v22, %v1131_v5  ;;  %v1176_v27 = vsel %vm646_vm4, %v2283_v49, %v1069_v23 }
 0x1ec   : > { %1729 = vmatmul.mubr.msk.f32.gmra.mrb[2].mxu1 %vm680_vm6, %v1191_v25 }
 0x1ee   : > { %v1133_v28 = vpop.permute.xlu0 %1132  ;;  %v1075_v26 = vpop.permute.xlu1 %1074 }
 0x1ef   : > { %v1192_v21 = vsel %vm663_vm5, %v1176_v27, %v1133_v28  ;;  %v1179_v43 = vsel %vm646_vm4, %v2296_v8, %v1075_v26 }
 0x1f0   : > { %1731 = vmatprep.mubr.msk.f32.mxu1 %vm680_vm6, %v1192_v21 }
 0x1f2   : > { %v1073_v30 = vpop.permute.xlu0 %1072  ;;  %v1135_v24 = vpop.permute.xlu1 %1134 }
 0x1f3   : > { %v1193_v37 = vsel %vm663_vm5, %v1177_v29, %v1135_v24  ;;  %v1178_v13 = vsel %vm646_vm4, %v2303_v16, %v1073_v30 }
 0x1f4   : > { %1732 = vmatmul.mubr.msk.f32.gmra.mrb[4].mxu1 %vm680_vm6, %v1193_v37 }
 0x1f6   : > { %v1137_v38 = vpop.permute.xlu0 %1136  ;;  %v1079_v49 = vpop.permute.xlu1 %1078 }
 0x1f7   : > { %v1194_v39 = vsel %vm663_vm5, %v1178_v13, %v1137_v38  ;;  %v1181_v54 = vsel %vm646_vm4, %v2316_v35, %v1079_v49 }
 0x1f8   : > { %1734 = vmatprep.mubr.msk.f32.mxu1 %vm680_vm6, %v1194_v39 }
 0x1fa   : > { %v1077_v48 = vpop.permute.xlu0 %1076  ;;  %v1139_v45 = vpop.permute.xlu1 %1138 }
 0x1fb   : > { %v1195_v50 = vsel %vm663_vm5, %v1179_v43, %v1139_v45  ;;  %v1180_v20 = vsel %vm646_vm4, %v2323_v36, %v1077_v48 }
 0x1fc   : > { %1735 = vmatmul.mubr.msk.f32.gmra.mrb[6].mxu1 %vm680_vm6, %v1195_v50 }
 0x1fe   : > { %v1141_v42 = vpop.permute.xlu0 %1140  ;;  %v1083_v16 = vpop.permute.xlu1 %1082 }
 0x1ff   : > { %v1196_v44 = vsel %vm663_vm5, %v1180_v20, %v1141_v42  ;;  %v1183_v63 = vsel %vm646_vm4, %v2336_v1, %v1083_v16 }
 0x200   : > { %1737 = vmatprep.mubr.msk.f32.mxu1 %vm680_vm6, %v1196_v44 }
 0x202   : > { %v1081_v61 = vpop.permute.xlu0 %1080  ;;  %v1143_v8 = vpop.permute.xlu1 %1142 }
 0x203   : > { %v1197_v0 = vsel %vm663_vm5, %v1181_v54, %v1143_v8  ;;  %v1182_v57 = vsel %vm646_vm4, %v2343_v3, %v1081_v61 }
 0x204   : > { %1738 = vmatmul.mubr.msk.f32.gmra.mrb[8].mxu1 %vm680_vm6, %v1197_v0  ;;  %v1809_v0 = vld [vmem:[%s1897_s18 + $0x20] sm:$0xff] }
 0x206   : > { %v1145_v60 = vpop.permute.xlu0 %1144  ;;  %v1087_v36 = vpop.permute.xlu1 %1086 }
 0x207   : > { %v1198_v55 = vsel %vm663_vm5, %v1182_v57, %v1145_v60  ;;  %v1185_v12 = vsel %vm646_vm4, %v2356_v31, %v1087_v36  ;;  %v2460_v31 = vld [vmem:[%s2562_s5] ss:$0 sm:$0xff] }
 0x208   : > { %1740 = vmatprep.mubr.msk.f32.mxu1 %vm680_vm6, %v1198_v55 }
 0x20a   : > { %v1085_v2 = vpop.permute.xlu0 %1084  ;;  %v1147_v35 = vpop.permute.xlu1 %1146 }
 0x20b   : > { %v1199_v6 = vsel %vm663_vm5, %v1183_v63, %v1147_v35  ;;  %v1184_v9 = vsel %vm646_vm4, %v2363_v32, %v1085_v2 }
 0x20c   : > { %1741 = vmatmul.mubr.msk.f32.gmra.mrb[10].mxu1 %vm680_vm6, %v1199_v6 }
 0x20e   : > { %v1149_v4 = vpop.permute.xlu0 %1148  ;;  %v1091_v3 = vpop.permute.xlu1 %1090 }
 0x20f   : > { %v1200_v7 = vsel %vm663_vm5, %v1184_v9, %v1149_v4  ;;  %v1187_v10 = vsel %vm646_vm4, %v2384_v56, %v1091_v3 }
 0x210   : > { %1743 = vmatprep.mubr.msk.f32.mxu1 %vm680_vm6, %v1200_v7 }
 0x212   : > { %v1089_v11 = vpop.permute.xlu0 %1088  ;;  %v1151_v1 = vpop.permute.xlu1 %1150 }
 0x213   : > { %v1201_v18 = vsel %vm663_vm5, %v1185_v12, %v1151_v1  ;;  %v1186_v32 = vsel %vm646_vm4, %v2388_v51, %v1089_v11  ;;  %v2465_v51 = vld [vmem:[%s2563_s6] ss:$0 sm:$0xff] }
 0x214   : > { %1744 = vmatmul.mubr.msk.f32.gmra.mrb[12].mxu1 %vm680_vm6, %v1201_v18 }
 0x216   : > { %v1155_v19 = vpop.permute.xlu1 %1154  ;;  %v1153_v22 = vpop.permute.xlu0 %1152 }
 0x217   : > { %v1203_v23 = vsel %vm663_vm5, %v1187_v10, %v1155_v19  ;;  %v1202_v5 = vsel %vm663_vm5, %v1186_v32, %v1153_v22 }
 0x218   : > { %1746 = vmatprep.mubr.msk.f32.mxu1 %vm680_vm6, %v1202_v5 }
 0x219   : > { %1747 = vmatmul.mubr.msk.f32.gmra.mrb[14].mxu1 %vm680_vm6, %v1203_v23 }
 0x2b7   : > { %v1727_v56 = vpop.f32.mrb[0].mxu1 }
 0x2b8   : > { %v1405_v25 = vmul.f32 %v1727_v56, %v2460_v31  ;;  %v1318_v27 = vpop.f32.mrb[1].mxu1 }
 0x2b9   : > { %v1404_v28 = vmul.f32 %v2460_v31, %v1318_v27 }
 0x2ba   : > { %v1428_v26 = vadd.f32 %v2465_v51, %v1405_v25 }
 0x2bb   : > { %v1427_v21 = vadd.f32 %v2465_v51, %v1404_v28 }
 0x2bc   : > { %v1444_v29 = vadd.f32 %v1428_v26, %v1912_v15 }
 0x2bd   : > { %v1443_v30 = vadd.f32 %v1427_v21, %v1909_v14  ;;  %v1808_v14 = vld [vmem:[%s1897_s18 + $0x18] sm:$0xff] }
 0x2be   : > { %v1460_v24 = vmax.f32 %v1444_v29, 0.0 }
 0x2bf   : > { %v1459_v37 = vmax.f32 %v1443_v30, 0.0  ;;  %v1730_v13 = vpop.f32.mrb[2].mxu1 }
 0x2c0   : > { %1476 = vst.msk [vmem:[%s2477_s10 + $0x8] sm:$0xff] %vm646_vm4, %v1460_v24  ;;  %v1407_v38 = vmul.f32 %v1730_v13, %v2460_v31  ;;  %v1328_v15 = vpop.f32.mrb[3].mxu1 }
 0x2c1   : > { %1475 = vst.msk [vmem:[%s2477_s10] sm:$0xff] %vm646_vm4, %v1459_v37  ;;  %v1406_v49 = vmul.f32 %v2460_v31, %v1328_v15 }
 0x2c2   : > { %v1430_v39 = vadd.f32 %v2465_v51, %v1407_v38 }
 0x2c3   : > { %v1429_v43 = vadd.f32 %v2465_v51, %v1406_v49 }
 0x2c4   : > { %v1446_v48 = vadd.f32 %v1808_v14, %v1430_v39 }
 0x2c5   : > { %v1445_v45 = vadd.f32 %v1429_v43, %v1921_v17 }
 0x2c6   : > { %v1462_v50 = vmax.f32 %v1446_v48, 0.0 }
 0x2c7   : > { %v1461_v20 = vmax.f32 %v1445_v45, 0.0  ;;  %v1733_v42 = vpop.f32.mrb[4].mxu1 }
 0x2c8   : > { %1478 = vst.msk [vmem:[%s2477_s10 + $0x18] sm:$0xff] %vm646_vm4, %v1462_v50  ;;  %v1409_v16 = vmul.f32 %v1733_v42, %v2460_v31  ;;  %v1338_v44 = vpop.f32.mrb[5].mxu1 }
 0x2c9   : > { %1477 = vst.msk [vmem:[%s2477_s10 + $0x10] sm:$0xff] %vm646_vm4, %v1461_v20  ;;  %v1408_v54 = vmul.f32 %v2460_v31, %v1338_v44 }
 0x2ca   : > { %v1432_v61 = vadd.f32 %v2465_v51, %v1409_v16 }
 0x2cb   : > { %v1431_v8 = vadd.f32 %v2465_v51, %v1408_v54 }
 0x2cc   : > { %v1448_v17 = vadd.f32 %v1432_v61, %v1959_v33 }
 0x2cd   : > { %v1447_v57 = vadd.f32 %v1809_v0, %v1431_v8 }
 0x2ce   : > { %v1464_v60 = vmax.f32 %v1448_v17, 0.0 }
 0x2cf   : > { %v1463_v36 = vmax.f32 %v1447_v57, 0.0  ;;  %v1736_v55 = vpop.f32.mrb[6].mxu1 }
 0x2d0   : > { %1480 = vst.msk [vmem:[%s2477_s10 + $0x28] sm:$0xff] %vm646_vm4, %v1464_v60  ;;  %v1411_v63 = vmul.f32 %v1736_v55, %v2460_v31  ;;  %v1348_v2 = vpop.f32.mrb[7].mxu1 }
 0x2d1   : > { %1479 = vst.msk [vmem:[%s2477_s10 + $0x20] sm:$0xff] %vm646_vm4, %v1463_v36  ;;  %v1410_v35 = vmul.f32 %v2460_v31, %v1348_v2 }
 0x2d2   : > { %v1434_v6 = vadd.f32 %v2465_v51, %v1411_v63 }
 0x2d3   : > { %v1433_v33 = vadd.f32 %v2465_v51, %v1410_v35 }
 0x2d4   : > { %v1450_v9 = vadd.f32 %v1434_v6, %v1977_v40 }
 0x2d5   : > { %v1449_v4 = vadd.f32 %v1433_v33, %v1962_v34 }
 0x2d6   : > { %v1466_v3 = vmax.f32 %v1450_v9, 0.0 }
 0x2d7   : > { %v1465_v7 = vmax.f32 %v1449_v4, 0.0  ;;  %v1739_v12 = vpop.f32.mrb[8].mxu1 }
 0x2d8   : > { %1482 = vst.msk [vmem:[%s2477_s10 + $0x38] sm:$0xff] %vm646_vm4, %v1466_v3  ;;  %v1413_v11 = vmul.f32 %v1739_v12, %v2460_v31  ;;  %v1358_v1 = vpop.f32.mrb[9].mxu1 }
 0x2d9   : > { %1481 = vst.msk [vmem:[%s2477_s10 + $0x30] sm:$0xff] %vm646_vm4, %v1465_v7  ;;  %v1412_v18 = vmul.f32 %v2460_v31, %v1358_v1 }
 0x2da   : > { %v1436_v10 = vadd.f32 %v2465_v51, %v1413_v11 }
 0x2db   : > { %v1435_v40 = vadd.f32 %v2465_v51, %v1412_v18 }
 0x2dc   : > { %v1452_v34 = vadd.f32 %v1436_v10, %v1995_v46 }
 0x2dd   : > { %v1451_v32 = vadd.f32 %v1435_v40, %v1980_v41 }
 0x2de   : > { %v1468_v19 = vmax.f32 %v1452_v34, 0.0 }
 0x2df   : > { %v1467_v22 = vmax.f32 %v1451_v32, 0.0  ;;  %v1742_v23 = vpop.f32.mrb[10].mxu1 }
 0x2e0   : > { %1484 = vst.msk [vmem:[%s2477_s10 + $0x48] sm:$0xff] %vm646_vm4, %v1468_v19  ;;  %v1415_v5 = vmul.f32 %v1742_v23, %v2460_v31  ;;  %v1368_v56 = vpop.f32.mrb[11].mxu1 }
 0x2e1   : > { %1483 = vst.msk [vmem:[%s2477_s10 + $0x40] sm:$0xff] %vm646_vm4, %v1467_v22  ;;  %v1414_v25 = vmul.f32 %v2460_v31, %v1368_v56 }
 0x2e2   : > { %v1438_v27 = vadd.f32 %v2465_v51, %v1415_v5 }
 0x2e3   : > { %v1437_v46 = vadd.f32 %v2465_v51, %v1414_v25 }
 0x2e4   : > { %v1454_v41 = vadd.f32 %v1438_v27, %v2013_v52 }
 0x2e5   : > { %v1453_v28 = vadd.f32 %v1437_v46, %v1998_v47 }
 0x2e6   : > { %v1470_v26 = vmax.f32 %v1454_v41, 0.0 }
 0x2e7   : > { %v1469_v21 = vmax.f32 %v1453_v28, 0.0  ;;  %v1745_v29 = vpop.f32.mrb[12].mxu1 }
 0x2e8   : > { %1486 = vst.msk [vmem:[%s2477_s10 + $0x58] sm:$0xff] %vm646_vm4, %v1470_v26  ;;  %v1417_v30 = vmul.f32 %v1745_v29, %v2460_v31  ;;  %v1378_v24 = vpop.f32.mrb[13].mxu1 }
 0x2e9   : > { %1485 = vst.msk [vmem:[%s2477_s10 + $0x50] sm:$0xff] %vm646_vm4, %v1469_v21  ;;  %v1416_v37 = vmul.f32 %v2460_v31, %v1378_v24 }
 0x2ea   : > { %v1440_v13 = vadd.f32 %v2465_v51, %v1417_v30 }
 0x2eb   : > { %v1439_v52 = vadd.f32 %v2465_v51, %v1416_v37 }
 0x2ec   : > { %v1456_v47 = vadd.f32 %v1440_v13, %v2031_v58  ;;  %v1748_v38 = vpop.f32.mrb[14].mxu1 }
 0x2ed   : > { %v1455_v15 = vadd.f32 %v1439_v52, %v2016_v53  ;;  %v1419_v49 = vmul.f32 %v1748_v38, %v2460_v31  ;;  %v1388_v39 = vpop.f32.mrb[15].mxu1 }
 0x2ee   : > { %v1472_v43 = vmax.f32 %v1456_v47, 0.0  ;;  %v1418_v14 = vmul.f32 %v2460_v31, %v1388_v39 }
 0x2ef   : > { %v1471_v48 = vmax.f32 %v1455_v15, 0.0  ;;  %v1442_v45 = vadd.f32 %v2465_v51, %v1419_v49 }
 0x2f0   : > { %1488 = vst.msk [vmem:[%s2477_s10 + $0x68] sm:$0xff] %vm646_vm4, %v1472_v43  ;;  %v1441_v50 = vadd.f32 %v2465_v51, %v1418_v14 }
 0x2f1   : > { %1487 = vst.msk [vmem:[%s2477_s10 + $0x60] sm:$0xff] %vm646_vm4, %v1471_v48  ;;  %v1458_v58 = vadd.f32 %v1442_v45, %v2041_v62 }
 0x2f2   : > { %v1457_v20 = vadd.f32 %v1441_v50, %v2034_v59 }
 0x2f3   : > { %v1474_v53 = vmax.f32 %v1458_v58, 0.0 }
 0x2f4   : > { %v1473_v42 = vmax.f32 %v1457_v20, 0.0 }
 0x2f5   : > { %1490 = vst.msk [vmem:[%s2477_s10 + $0x78] sm:$0xff] %vm646_vm4, %v1474_v53 }
 0x2f6   : > { %1489 = vst.msk [vmem:[%s2477_s10 + $0x70] sm:$0xff] %vm646_vm4, %v1473_v42 }
 0x2f7 PF: > { %s17_s24 = sadd.s32 1, %s1816_s24  }
 0x2f8   : > { %p14_p4 = scmp.ge.s32.totalorder %s17_s24, 4  }
 0x2fa   :  { %16 = sbr.rel (!%p14_p4) target bundleno = 1 (0x1), region = 78 }

</bundles_post_ra>
